<compile_context>
chip_gen: v6e
topology: v6e:2x2x1
jax: 0.10.0
libtpu: 0.0.40
codegen_flags: <defaults>
</compile_context>

<pallas_src>
import functools

import jax
import jax.numpy as jnp
from jax import lax
from jax.experimental import pallas as pl
from jax.experimental.pallas import tpu as pltpu

_EPS = 1e-8  # torch.nn.CosineSimilarity default eps


def _round_up(x, m):
    return ((x + m - 1) // m) * m


def _cosine_sim_kernel(x_ref, y_ref, o_ref, acc_ref, xsq_ref, ysq_ref, *, inv_temp):
    # x_ref: (tm, tk), y_ref: (tn, tk), o_ref: (tm, tn)
    k = pl.program_id(2)

    @pl.when(k == 0)
    def _():
        acc_ref[...] = jnp.zeros_like(acc_ref)
        xsq_ref[...] = jnp.zeros_like(xsq_ref)
        ysq_ref[...] = jnp.zeros_like(ysq_ref)

    x = x_ref[...]  # native dtype (f32 or bf16) straight to the MXU
    y = y_ref[...]

    # MXU: contract both operands on the H axis (no explicit y.T).
    acc_ref[...] += lax.dot_general(
        x, y,
        dimension_numbers=(((1,), (1,)), ((), ())),
        preferred_element_type=jnp.float32,
    )

    # Row sum-of-squares accumulated in f32 (safe for bf16 inputs).
    # O(tm*tk + tn*tk) VPU work per tile -- hidden under the O(tm*tn*tk) matmul.
    xf = x.astype(jnp.float32)
    yf = y.astype(jnp.float32)
    xsq_ref[...] += jnp.sum(xf * xf, axis=-1, keepdims=True)  # (tm, 1)
    ysq_ref[...] += jnp.sum(yf * yf, axis=-1, keepdims=True)  # (tn, 1)

    @pl.when(k == pl.num_programs(2) - 1)
    def _():
        # Per-side norm clamp at eps; 1/temp folded into the x-side scale.
        inv_x = lax.rsqrt(jnp.maximum(xsq_ref[...], _EPS * _EPS)) * inv_temp  # (tm, 1)
        inv_y = lax.rsqrt(jnp.maximum(ysq_ref[...], _EPS * _EPS))             # (tn, 1)
        o_ref[...] = (acc_ref[...] * inv_x * inv_y.T).astype(o_ref.dtype)


def similarity(x, y, temp, *, tm_max=256, tn_max=256, tk_max=512):
    """Pairwise cosine similarity / temp.

    Accepts x of shape (N, 1, H) or (N, H) and y of shape (1, M, H) or (M, H),
    reproducing the PyTorch broadcast `cos(x, y)` -> (N, M) result.
    """
    # TODO(synk): only the (N,1,H)/(1,M,H) (and 2-D) broadcast pattern is
    # supported; other torch-broadcastable shapes are not handled.
    if x.ndim == 3:
        x = jnp.squeeze(x, axis=1)
    if y.ndim == 3:
        y = jnp.squeeze(y, axis=0)
    N, H = x.shape
    M, H2 = y.shape
    assert H == H2, "feature dims must match"

    # Tile sizes: lane-dense output (tn multiple of 128), sublane-aligned tm,
    # 128-multiple contraction tiles.  Moderate caps fit every generation's
    # default scoped VMEM (incl. v5e 16 MiB, v7x 32 MiB) with double-buffering.
    tm = min(tm_max, _round_up(N, 8))
    tn = min(tn_max, _round_up(M, 128))
    tk = min(tk_max, _round_up(H, 128))

    Np, Mp, Hp = _round_up(N, tm), _round_up(M, tn), _round_up(H, tk)
    x_p = jnp.pad(x, ((0, Np - N), (0, Hp - H))) if (Np != N or Hp != H) else x
    y_p = jnp.pad(y, ((0, Mp - M), (0, Hp - H))) if (Mp != M or Hp != H) else y

    grid = (Np // tm, Mp // tn, Hp // tk)
    kernel = functools.partial(_cosine_sim_kernel, inv_temp=float(1.0 / temp))

    out = pl.pallas_call(
        kernel,
        out_shape=jax.ShapeDtypeStruct((Np, Mp), jnp.float32),
        grid_spec=pltpu.PrefetchScalarGridSpec(
            num_scalar_prefetch=0,
            grid=grid,
            in_specs=[
                pl.BlockSpec((tm, tk), lambda i, j, k: (i, k)),
                pl.BlockSpec((tn, tk), lambda i, j, k: (j, k)),
            ],
            out_specs=pl.BlockSpec((tm, tn), lambda i, j, k: (i, j)),
            scratch_shapes=[
                pltpu.VMEM((tm, tn), jnp.float32),  # matmul accumulator
                pltpu.VMEM((tm, 1), jnp.float32),   # sum-of-squares of x rows
                pltpu.VMEM((tn, 1), jnp.float32),   # sum-of-squares of y rows
            ],
        ),
        compiler_params=pltpu.CompilerParams(
            dimension_semantics=("parallel", "parallel", "arbitrary"),
            vmem_limit_bytes=32 * 1024 * 1024,
        ),
    )(x_p, y_p)

    return out[:N, :M]


def _reference(x, y, temp):
    # Pure-JAX reference matching torch.nn.CosineSimilarity(dim=-1)(x, y) / temp
    xs = jnp.squeeze(x, axis=1) if x.ndim == 3 else x
    ys = jnp.squeeze(y, axis=0) if y.ndim == 3 else y
    xs = xs.astype(jnp.float32)
    ys = ys.astype(jnp.float32)
    dots = xs @ ys.T
    xn = jnp.maximum(jnp.linalg.norm(xs, axis=-1, keepdims=True), _EPS)
    yn = jnp.maximum(jnp.linalg.norm(ys, axis=-1, keepdims=True), _EPS)
    return dots / (xn * yn.T) / temp


if __name__ == "__main__":
    key = jax.random.PRNGKey(0)
    k1, k2, k3, k4 = jax.random.split(key, 4)
    temp = 0.05  # typical SimCSE temperature (module hyperparameter)

    # Case 1: module-style broadcast shapes, small (N, 1, H) x (1, M, H).
    N, M, H = 8, 12, 64
    x = jax.random.normal(k1, (N, 1, H), dtype=jnp.float32)
    y = jax.random.normal(k2, (1, M, H), dtype=jnp.float32)
    out = jax.block_until_ready(similarity(x, y, temp))
    ref = _reference(x, y, temp)
    assert out.shape == (N, M)
    assert jnp.allclose(out, ref, atol=1e-3, rtol=1e-3), "case-1 mismatch"

    # Case 2: exercises multi-tile grid (2 i-tiles, 2 j-tiles, 2 k-tiles) and
    # the k-axis accumulator / padding paths.
    N2, M2, H2 = 300, 260, 640
    x2 = jax.random.normal(k3, (N2, H2), dtype=jnp.float32)
    y2 = jax.random.normal(k4, (M2, H2), dtype=jnp.float32)
    out2 = jax.block_until_ready(similarity(x2, y2, temp))
    ref2 = _reference(x2, y2, temp)
    assert out2.shape == (N2, M2)
    assert jnp.allclose(out2, ref2, atol=1e-3, rtol=1e-3), "case-2 mismatch"

    print("KERNEL_OK")
</pallas_src>

<mosaic_0001>
module attributes {stable_mosaic.version = 11 : i64} {
  func.func @_cosine_sim_kernel(%arg0: i32, %arg1: i32, %arg2: i32, %arg3: memref<8x128xf32, #tpu.memory_space<vmem>>, %arg4: memref<128x128xf32, #tpu.memory_space<vmem>>, %arg5: memref<8x128xf32, #tpu.memory_space<vmem>>, %arg6: memref<8x128xf32, #tpu.memory_space<vmem>>, %arg7: memref<8x1xf32, #tpu.memory_space<vmem>>, %arg8: memref<128x1xf32, #tpu.memory_space<vmem>>) attributes {dimension_semantics = [#tpu.dimension_semantics<parallel>, #tpu.dimension_semantics<parallel>, #tpu.dimension_semantics<arbitrary>], iteration_bounds = array<i64: 1, 1, 1>, scalar_prefetch = 0 : i64, scratch_operands = 3 : i64, tpu.core_type = #tpu.core_type<tc>, window_params = [{transform_indices = @transform_0, window_bounds = array<i64: 8, 128>}, {transform_indices = @transform_1, window_bounds = array<i64: 128, 128>}, {transform_indices = @transform_2, window_bounds = array<i64: 8, 128>}]} {
    %c0_i32 = arith.constant 0 : i32
    %0 = arith.cmpi eq, %arg2, %c0_i32 : i32
    %1 = arith.extui %0 : i1 to i32
    %c0_i32_0 = arith.constant 0 : i32
    %2 = arith.cmpi ne, %1, %c0_i32_0 : i32
    scf.if %2 {
      %cst_20 = arith.constant 0.000000e+00 : f32
      %24 = vector.broadcast %cst_20 : f32 to vector<8x128xf32>
      %c0_21 = arith.constant 0 : index
      %c0_22 = arith.constant 0 : index
      %25 = vector.load %arg6[%c0_21, %c0_22] : memref<8x128xf32, #tpu.memory_space<vmem>>, vector<8x128xf32>
      tpu.vector_store %arg6[%c0_21, %c0_22], %24 {strides = array<i32>} : memref<8x128xf32, #tpu.memory_space<vmem>>, vector<8x128xf32>,
      %cst_23 = arith.constant 0.000000e+00 : f32
      %26 = vector.broadcast %cst_23 : f32 to vector<8x1xf32>
      %c0_24 = arith.constant 0 : index
      %c0_25 = arith.constant 0 : index
      %27 = vector.load %arg7[%c0_24, %c0_25] : memref<8x1xf32, #tpu.memory_space<vmem>>, vector<8x1xf32>
      tpu.vector_store %arg7[%c0_24, %c0_25], %26 {strides = array<i32>} : memref<8x1xf32, #tpu.memory_space<vmem>>, vector<8x1xf32>,
      %cst_26 = arith.constant 0.000000e+00 : f32
      %28 = vector.broadcast %cst_26 : f32 to vector<128x1xf32>
      %c0_27 = arith.constant 0 : index
      %c0_28 = arith.constant 0 : index
      %29 = vector.load %arg8[%c0_27, %c0_28] : memref<128x1xf32, #tpu.memory_space<vmem>>, vector<128x1xf32>
      tpu.vector_store %arg8[%c0_27, %c0_28], %28 {strides = array<i32>} : memref<128x1xf32, #tpu.memory_space<vmem>>, vector<128x1xf32>,
    } else {
    }
    %c0 = arith.constant 0 : index
    %c0_1 = arith.constant 0 : index
    %3 = vector.load %arg3[%c0, %c0_1] : memref<8x128xf32, #tpu.memory_space<vmem>>, vector<8x128xf32>
    %c0_2 = arith.constant 0 : index
    %c0_3 = arith.constant 0 : index
    %4 = vector.load %arg4[%c0_2, %c0_3] : memref<128x128xf32, #tpu.memory_space<vmem>>, vector<128x128xf32>
    %c0_4 = arith.constant 0 : index
    %c0_5 = arith.constant 0 : index
    %5 = vector.load %arg6[%c0_4, %c0_5] : memref<8x128xf32, #tpu.memory_space<vmem>>, vector<8x128xf32>
    %cst = arith.constant dense<0.000000e+00> : vector<8x128xf32>
    %6 = tpu.matmul %3, %4, %cst {dimension_numbers = #tpu.dot_dimension_numbers<[1], [1], [0], [0], [0, 0, 1, 0], [], []>} : vector<8x128xf32>, vector<128x128xf32>, vector<8x128xf32> -> vector<8x128xf32>
    %7 = arith.addf %5, %6 : vector<8x128xf32>
    %c0_6 = arith.constant 0 : index
    %c0_7 = arith.constant 0 : index
    %8 = vector.load %arg6[%c0_6, %c0_7] : memref<8x128xf32, #tpu.memory_space<vmem>>, vector<8x128xf32>
    tpu.vector_store %arg6[%c0_6, %c0_7], %7 {strides = array<i32>} : memref<8x128xf32, #tpu.memory_space<vmem>>, vector<8x128xf32>,
    %c0_8 = arith.constant 0 : index
    %c0_9 = arith.constant 0 : index
    %9 = vector.load %arg7[%c0_8, %c0_9] : memref<8x1xf32, #tpu.memory_space<vmem>>, vector<8x1xf32>
    %10 = arith.mulf %3, %3 : vector<8x128xf32>
    %cst_10 = arith.constant dense<0.000000e+00> : vector<8xf32>
    %11 = vector.multi_reduction <add>, %10, %cst_10 [1] : vector<8x128xf32> to vector<8xf32>
    %12 = vector.shape_cast %11 : vector<8xf32> to vector<8x1xf32>
    %13 = arith.addf %9, %12 : vector<8x1xf32>
    %c0_11 = arith.constant 0 : index
    %c0_12 = arith.constant 0 : index
    %14 = vector.load %arg7[%c0_11, %c0_12] : memref<8x1xf32, #tpu.memory_space<vmem>>, vector<8x1xf32>
    tpu.vector_store %arg7[%c0_11, %c0_12], %13 {strides = array<i32>} : memref<8x1xf32, #tpu.memory_space<vmem>>, vector<8x1xf32>,
    %c0_13 = arith.constant 0 : index
    %c0_14 = arith.constant 0 : index
    %15 = vector.load %arg8[%c0_13, %c0_14] : memref<128x1xf32, #tpu.memory_space<vmem>>, vector<128x1xf32>
    %16 = arith.mulf %4, %4 : vector<128x128xf32>
    %cst_15 = arith.constant dense<0.000000e+00> : vector<128xf32>
    %17 = vector.multi_reduction <add>, %16, %cst_15 [1] : vector<128x128xf32> to vector<128xf32>
    %18 = vector.shape_cast %17 : vector<128xf32> to vector<128x1xf32>
    %19 = arith.addf %15, %18 : vector<128x1xf32>
    %c0_16 = arith.constant 0 : index
    %c0_17 = arith.constant 0 : index
    %20 = vector.load %arg8[%c0_16, %c0_17] : memref<128x1xf32, #tpu.memory_space<vmem>>, vector<128x1xf32>
    tpu.vector_store %arg8[%c0_16, %c0_17], %19 {strides = array<i32>} : memref<128x1xf32, #tpu.memory_space<vmem>>, vector<128x1xf32>,
    %c0_i32_18 = arith.constant 0 : i32
    %21 = arith.cmpi eq, %arg2, %c0_i32_18 : i32
    %22 = arith.extui %21 : i1 to i32
    %c0_i32_19 = arith.constant 0 : i32
    %23 = arith.cmpi ne, %22, %c0_i32_19 : i32
    scf.if %23 {
      %c0_20 = arith.constant 0 : index
      %c0_21 = arith.constant 0 : index
      %24 = vector.load %arg7[%c0_20, %c0_21] : memref<8x1xf32, #tpu.memory_space<vmem>>, vector<8x1xf32>
      %cst_22 = arith.constant 1.000000e-16 : f32
      %25 = vector.broadcast %cst_22 : f32 to vector<8x1xf32>
      %26 = arith.maximumf %24, %25 : vector<8x1xf32>
      %27 = math.rsqrt %26 : vector<8x1xf32>
      %cst_23 = arith.constant 2.000000e+01 : f32
      %28 = vector.broadcast %cst_23 : f32 to vector<8x1xf32>
      %29 = arith.mulf %27, %28 : vector<8x1xf32>
      %c0_24 = arith.constant 0 : index
      %c0_25 = arith.constant 0 : index
      %30 = vector.load %arg8[%c0_24, %c0_25] : memref<128x1xf32, #tpu.memory_space<vmem>>, vector<128x1xf32>
      %cst_26 = arith.constant 1.000000e-16 : f32
      %31 = vector.broadcast %cst_26 : f32 to vector<128x1xf32>
      %32 = arith.maximumf %30, %31 : vector<128x1xf32>
      %33 = math.rsqrt %32 : vector<128x1xf32>
      %c0_27 = arith.constant 0 : index
      %c0_28 = arith.constant 0 : index
      %34 = vector.load %arg6[%c0_27, %c0_28] : memref<8x128xf32, #tpu.memory_space<vmem>>, vector<8x128xf32>
      %35 = vector.broadcast %29 : vector<8x1xf32> to vector<8x128xf32>
      %36 = arith.mulf %34, %35 : vector<8x128xf32>
      %37 = tpu.transpose %33, [1, 0] : vector<128x1xf32> -> vector<1x128xf32>
      %38 = vector.broadcast %37 : vector<1x128xf32> to vector<8x128xf32>
      %39 = arith.mulf %36, %38 : vector<8x128xf32>
      %c0_29 = arith.constant 0 : index
      %c0_30 = arith.constant 0 : index
      %40 = vector.load %arg5[%c0_29, %c0_30] : memref<8x128xf32, #tpu.memory_space<vmem>>, vector<8x128xf32>
      tpu.vector_store %arg5[%c0_29, %c0_30], %39 {strides = array<i32>} : memref<8x128xf32, #tpu.memory_space<vmem>>, vector<8x128xf32>,
    } else {
    }
    return
  }
  func.func @transform_0(%arg0: i32, %arg1: i32, %arg2: i32) -> (i32, i32) {
    %c0_i32 = arith.constant 0 : i32
    return %arg0, %arg2 : i32, i32
  }
  func.func @transform_1(%arg0: i32, %arg1: i32, %arg2: i32) -> (i32, i32) {
    %c0_i32 = arith.constant 0 : i32
    return %arg1, %arg2 : i32, i32
  }
  func.func @transform_2(%arg0: i32, %arg1: i32, %arg2: i32) -> (i32, i32) {
    %c0_i32 = arith.constant 0 : i32
    return %arg0, %arg1 : i32, i32
  }
}

</mosaic_0001>

<bundles_post_ra>
// kernel: tpu_custom_call.1
= control target key start
LH: loop header
LB: loop body
LE: loop exit
PB: predicated region body
PF: predicated region fallthrough
CT: control target
= control target key end

     0   :  { %7 = vsyncpa [#allocation6], 0  ;;  %s659_s0 = inlined_call_operand.hbm [shape: f32[8,128], index: 0, kind: input, shape index: {}]   ;;  %s660_s1 = inlined_call_operand.hbm [shape: f32[128,128], index: 1, kind: input, shape index: {}]   ;;  %s661_s2 = inlined_call_operand.hbm [shape: f32[8,128], index: 2, kind: output, shape index: {}]  }
   0x1   :  { %8 = vsyncpa [#allocation9], 0 }
   0x2   :  { %9 = vsyncpa [#allocation7], 0  ;;  %s532_s9 = smov [#allocation5]   ;;  %s533_s11 = smov [#allocation8]  }
   0x3   :  { %s16_s10 = sshll.u32 %s532_s9, 4  ;;  %s25_s12 = sshll.u32 %s533_s11, 4  ;;  %s17_s10 = int_to_ptr.vmem [resolvable:$true] %s16_s10  ;;  %s26_s12 = int_to_ptr.vmem [resolvable:$true] %s25_s12 }
   0x4   :  { %s474_s13 = scalar_lea.vmem %s17_s10, 128  ;;  %p479_p1 = scmp.lt.s32.totalorder %s17_s10, %s17_s10 }
   0x5   :  { %p475_p0 = scmp.ne.s32.totalorder %s17_s10, %s474_s13  ;;  %p480_p2 = scmp.lt.s32.totalorder %s474_s13, %s474_s13 }
   0x7   :  { %p481_p3 = por %p480_p2, %p479_p1 }
   0x9   :  { %p482_p4 = pnand %p481_p3, %p475_p0 }
   0xb   :  { %485 = shalt.err (!%p482_p4)
}
   0xc   :  { %19 = dma.hbm_to_vmem [thread:$0]  %s659_s0, 128, %s17_s10, [#allocation6]  }
   0xd   :  { %s494_s16 = scalar_lea.vmem %s26_s12, 2048  ;;  %p499_p6 = scmp.lt.s32.totalorder %s26_s12, %s26_s12 }
   0xe   :  { %p495_p5 = scmp.ne.s32.totalorder %s26_s12, %s494_s16  ;;  %p500_p7 = scmp.lt.s32.totalorder %s494_s16, %s494_s16 }
  0x10   :  { %p501_p8 = por %p500_p7, %p499_p6 }
  0x12   :  { %p502_p9 = pnand %p501_p8, %p495_p5 }
  0x14   :  { %505 = shalt.err (!%p502_p9)
}
  0x15   :  { %s534_s17 = smov 128   ;;  %s535_s18 = smov 8  }
  0x16   :  { %31 = dma.hbm_to_vmem [thread:$0]  %s660_s1, 2048, %s26_s12, [#allocation9], %s534_s17, %s534_s17, %s535_s18  }
  0x17   :  { %526 = dma.done.wait [#allocation6], 128  }
  0x18   :  { %527 = vsyncadd [#allocation6], 4294967168 }
  0x19   :  { %528 = dma.done.wait [#allocation9], 2048  }
  0x1a   :  { %529 = vsyncadd [#allocation9], 4294965248  ;;  %vm43_vm0 = vcmask 7168   ;;  %v536_v0 = vmov 0.0   ;;  %vm537_vm1 = vmmov 0   ;;  %v597_v1 = vld [vmem:[#allocation5] sm:$0xff] }
  0x1b   :  { %387 = vmatprep.subr.mxu0 %v536_v0  ;;  %419 = vmatprep.mubr.msk.f32.mxu0 %vm537_vm1, %v536_v0  ;;  %44 = vst.msk [vmem:[#allocation3] sm:$0xff] %vm43_vm0, %v536_v0  ;;  %45 = vst.msk [vmem:[#allocation4] sm:$0xff] %vm43_vm0, %v536_v0  ;;  %v599_v2 = vld [vmem:[#allocation8] sm:$0xff]  ;;  %v601_v3 = vld [vmem:[#allocation8 + $0x8] sm:$0xff]  ;;  %v152_v4 = vmul.f32 %v597_v1, %v597_v1  ;;  %v538_v34 = vmov 0   ;;  %s539_s0 = smov [#allocation10]  }
  0x1c   :  { %46 = vst.msk [vmem:[#allocation4 + $0x8] sm:$0xff] %vm43_vm0, %v536_v0  ;;  %47 = vst.msk [vmem:[#allocation4 + $0x10] sm:$0xff] %vm43_vm0, %v536_v0  ;;  %v175_v5 = vmul.f32 %v601_v3, %v601_v3  ;;  %v607_v6 = vld [vmem:[#allocation8 + $0x10] sm:$0xff]  ;;  %v174_v7 = vmul.f32 %v599_v2, %v599_v2  ;;  %v77_v9 = vld [vmem:[#allocation8 + $0x78] sm:$0xff]  ;;  %430 = vset.pattern.permute.xlu1 %v538_v34  ;;  %s360_s1 = sshll.u32 %s539_s0, 4  ;;  %s361_s1 = int_to_ptr.vmem [resolvable:$true] %s360_s1 }
  0x1d   :  { %48 = vst.msk [vmem:[#allocation4 + $0x18] sm:$0xff] %vm43_vm0, %v536_v0  ;;  %49 = vst.msk [vmem:[#allocation4 + $0x20] sm:$0xff] %vm43_vm0, %v536_v0  ;;  %153 = vadd.xlane.f32.xlu0 %v152_v4  ;;  %v176_v8 = vmul.f32 %v607_v6, %v607_v6  ;;  %v613_v10 = vld [vmem:[#allocation8 + $0x18] sm:$0xff]  ;;  %v66_v11 = vld [vmem:[#allocation8 + $0x20] sm:$0xff]  ;;  %388 = vmatpush3.xpose.msra.mxu0 %v77_v9  ;;  %v189_v35 = vmul.f32 %v77_v9, %v77_v9  ;;  %s506_s21 = scalar_lea.vmem %s361_s1, 128  ;;  %p511_p11 = scmp.lt.s32.totalorder %s361_s1, %s361_s1 }
  0x1e   :  { %50 = vst.msk [vmem:[#allocation4 + $0x28] sm:$0xff] %vm43_vm0, %v536_v0  ;;  %51 = vst.msk [vmem:[#allocation4 + $0x30] sm:$0xff] %vm43_vm0, %v536_v0  ;;  %192 = vadd.xlane.f32.xlu1 %v175_v5  ;;  %389 = vmatprep.subr.mxu0 %v536_v0  ;;  %v76_v12 = vld [vmem:[#allocation8 + $0x70] sm:$0xff]  ;;  %v177_v13 = vmul.f32 %v613_v10, %v613_v10  ;;  %v178_v14 = vmul.f32 %v66_v11, %v66_v11  ;;  %v67_v15 = vld [vmem:[#allocation8 + $0x28] sm:$0xff]  ;;  %p507_p10 = scmp.ne.s32.totalorder %s361_s1, %s506_s21  ;;  %p512_p12 = scmp.lt.s32.totalorder %s506_s21, %s506_s21 }
  0x1f   :  { %52 = vst.msk [vmem:[#allocation4 + $0x38] sm:$0xff] %vm43_vm0, %v536_v0  ;;  %53 = vst.msk [vmem:[#allocation4 + $0x40] sm:$0xff] %vm43_vm0, %v536_v0  ;;  %v68_v16 = vld [vmem:[#allocation8 + $0x30] sm:$0xff]  ;;  %v75_v17 = vld [vmem:[#allocation8 + $0x68] sm:$0xff]  ;;  %v179_v18 = vmul.f32 %v67_v15, %v67_v15  ;;  %v188_v33 = vmul.f32 %v76_v12, %v76_v12 }
  0x20   :  { %54 = vst.msk [vmem:[#allocation4 + $0x48] sm:$0xff] %vm43_vm0, %v536_v0  ;;  %55 = vst.msk [vmem:[#allocation4 + $0x50] sm:$0xff] %vm43_vm0, %v536_v0  ;;  %v180_v19 = vmul.f32 %v68_v16, %v68_v16  ;;  %v69_v20 = vld [vmem:[#allocation8 + $0x38] sm:$0xff]  ;;  %v70_v21 = vld [vmem:[#allocation8 + $0x40] sm:$0xff]  ;;  %v187_v32 = vmul.f32 %v75_v17, %v75_v17  ;;  %p513_p13 = por %p512_p12, %p511_p11 }
  0x21   :  { %56 = vst.msk [vmem:[#allocation4 + $0x58] sm:$0xff] %vm43_vm0, %v536_v0  ;;  %57 = vst.msk [vmem:[#allocation4 + $0x60] sm:$0xff] %vm43_vm0, %v536_v0  ;;  %190 = vadd.xlane.f32.xlu0 %v174_v7  ;;  %390 = vmatpush3.xpose.msra.mxu0 %v76_v12  ;;  %v74_v22 = vld [vmem:[#allocation8 + $0x60] sm:$0xff]  ;;  %v181_v23 = vmul.f32 %v69_v20, %v69_v20  ;;  %v182_v24 = vmul.f32 %v70_v21, %v70_v21  ;;  %v71_v25 = vld [vmem:[#allocation8 + $0x48] sm:$0xff] }
  0x22   :  { %58 = vst.msk [vmem:[#allocation4 + $0x68] sm:$0xff] %vm43_vm0, %v536_v0  ;;  %59 = vst.msk [vmem:[#allocation4 + $0x70] sm:$0xff] %vm43_vm0, %v536_v0  ;;  %194 = vadd.xlane.f32.xlu1 %v176_v8  ;;  %391 = vmatprep.subr.mxu0 %v536_v0  ;;  %v72_v26 = vld [vmem:[#allocation8 + $0x50] sm:$0xff]  ;;  %v183_v27 = vmul.f32 %v71_v25, %v71_v25  ;;  %v73_v29 = vld [vmem:[#allocation8 + $0x58] sm:$0xff]  ;;  %v186_v31 = vmul.f32 %v74_v22, %v74_v22  ;;  %p514_p0 = pnand %p513_p13, %p507_p10 }
  0x23   :  { %60 = vst.msk [vmem:[#allocation4 + $0x78] sm:$0xff] %vm43_vm0, %v536_v0  ;;  %v184_v28 = vmul.f32 %v72_v26, %v72_v26  ;;  %v185_v30 = vmul.f32 %v73_v29, %v73_v29  ;;  %v151_v36 = vld [vmem:[#allocation3] sm:$0xff]  ;;  %v159_v37 = vld [vmem:[#allocation4 + $0x8] sm:$0xff]  ;;  %v158_v42 = vld [vmem:[#allocation4] sm:$0xff] }
  0x24   :  { %v160_v43 = vld [vmem:[#allocation4 + $0x10] sm:$0xff]  ;;  %v161_v48 = vld [vmem:[#allocation4 + $0x18] sm:$0xff]  ;;  %v162_v49 = vld [vmem:[#allocation4 + $0x20] sm:$0xff] }
  0x25   :  { %196 = vadd.xlane.f32.xlu0 %v177_v13  ;;  %392 = vmatpush3.xpose.msra.mxu0 %v75_v17  ;;  %v163_v54 = vld [vmem:[#allocation4 + $0x28] sm:$0xff]  ;;  %v164_v55 = vld [vmem:[#allocation4 + $0x30] sm:$0xff] }
  0x26   :  { %198 = vadd.xlane.f32.xlu1 %v178_v14  ;;  %393 = vmatprep.subr.mxu0 %v536_v0 }
  0x27   :  { %v167_v9 = vld [vmem:[#allocation4 + $0x48] sm:$0xff] }
  0x28   :  { %v169_v17 = vld [vmem:[#allocation4 + $0x58] sm:$0xff] }
  0x29   :  { %200 = vadd.xlane.f32.xlu0 %v179_v18  ;;  %394 = vmatpush3.xpose.msra.mxu0 %v74_v22  ;;  %v170_v18 = vld [vmem:[#allocation4 + $0x60] sm:$0xff] }
  0x2a   :  { %202 = vadd.xlane.f32.xlu1 %v180_v19  ;;  %395 = vmatprep.subr.mxu0 %v536_v0 }
  0x2d   :  { %204 = vadd.xlane.f32.xlu0 %v181_v23  ;;  %396 = vmatpush3.xpose.msra.mxu0 %v73_v29 }
  0x2e   :  { %206 = vadd.xlane.f32.xlu1 %v182_v24  ;;  %397 = vmatprep.subr.mxu0 %v536_v0 }
  0x31   :  { %208 = vadd.xlane.f32.xlu0 %v183_v27  ;;  %398 = vmatpush3.xpose.msra.mxu0 %v72_v26  ;;  %v171_v26 = vld [vmem:[#allocation4 + $0x68] sm:$0xff]  ;;  %v172_v27 = vld [vmem:[#allocation4 + $0x70] sm:$0xff] }
  0x32   :  { %210 = vadd.xlane.f32.xlu1 %v184_v28  ;;  %399 = vmatprep.subr.mxu0 %v536_v0 }
  0x35   :  { %212 = vadd.xlane.f32.xlu0 %v185_v30  ;;  %400 = vmatpush3.xpose.msra.mxu0 %v71_v25 }
  0x36   :  { %214 = vadd.xlane.f32.xlu1 %v186_v31  ;;  %401 = vmatprep.subr.mxu0 %v536_v0 }
  0x39   :  { %216 = vadd.xlane.f32.xlu0 %v187_v32  ;;  %402 = vmatpush3.xpose.msra.mxu0 %v70_v21 }
  0x3a   :  { %218 = vadd.xlane.f32.xlu1 %v188_v33  ;;  %403 = vmatprep.subr.mxu0 %v536_v0 }
  0x3d   :  { %220 = vadd.xlane.f32.xlu0 %v189_v35  ;;  %404 = vmatpush3.xpose.msra.mxu0 %v69_v20 }
  0x3e   :  { %405 = vmatprep.subr.mxu0 %v536_v0 }
  0x41   :  { %406 = vmatpush3.xpose.msra.mxu0 %v68_v16 }
  0x42   :  { %407 = vmatprep.subr.mxu0 %v536_v0 }
  0x45   :  { %408 = vmatpush3.xpose.msra.mxu0 %v67_v15 }
  0x46   :  { %409 = vmatprep.subr.mxu0 %v536_v0 }
  0x49   :  { %410 = vmatpush3.xpose.msra.mxu0 %v66_v11 }
  0x4a   :  { %411 = vmatprep.subr.mxu0 %v536_v0 }
  0x4d   :  { %412 = vmatpush3.xpose.msra.mxu0 %v613_v10  ;;  %v168_v10 = vld [vmem:[#allocation4 + $0x50] sm:$0xff] }
  0x4e   :  { %413 = vmatprep.subr.mxu0 %v536_v0 }
  0x51   :  { %414 = vmatpush3.xpose.msra.mxu0 %v607_v6 }
  0x52   :  { %415 = vmatprep.subr.mxu0 %v536_v0 }
  0x55   :  { %416 = vmatpush3.xpose.msra.mxu0 %v601_v3 }
  0x56   :  { %417 = vmatprep.subr.mxu0 %v536_v0  ;;  %v165_v0 = vld [vmem:[#allocation4 + $0x38] sm:$0xff] }
  0x59   :  { %418 = vmatpush3.xpose.msra.mxu0 %v599_v2 }
  0x5c   :  { %420 = vmatmul.mubr.f32.vlgmr.msra.gmra.mxu0 %v597_v1  ;;  %v166_v1 = vld [vmem:[#allocation4 + $0x40] sm:$0xff] }
  0xa6   :  { %v154_v38 = vpop.xlane.xlu0 %153 }
  0xa7   :  { %v193_v39 = vpop.xlane.xlu1 %192  ;;  %v155_v40 = vadd.f32 %v154_v38, %v151_v36 }
  0xa8   :  { %v223_v41 = vadd.f32 %v193_v39, %v159_v37  ;;  %v173_v37 = vld [vmem:[#allocation4 + $0x78] sm:$0xff] }
  0xa9   :  { %157 = vst.msk [vmem:[#allocation3] sm:$0xff] %vm43_vm0, %v155_v40 }
  0xaa   :  { %239 = vst.msk [vmem:[#allocation4 + $0x8] sm:$0xff] %vm43_vm0, %v223_v41  ;;  %v191_v44 = vpop.xlane.xlu0 %190 }
  0xab   :  { %v195_v45 = vpop.xlane.xlu1 %194  ;;  %v222_v46 = vadd.f32 %v191_v44, %v158_v42 }
  0xac   :  { %v224_v47 = vadd.f32 %v195_v45, %v160_v43 }
  0xad   :  { %238 = vst.msk [vmem:[#allocation4] sm:$0xff] %vm43_vm0, %v222_v46 }
  0xae   :  { %240 = vst.msk [vmem:[#allocation4 + $0x10] sm:$0xff] %vm43_vm0, %v224_v47  ;;  %v197_v50 = vpop.xlane.xlu0 %196 }
  0xaf   :  { %v199_v51 = vpop.xlane.xlu1 %198  ;;  %v225_v52 = vadd.f32 %v197_v50, %v161_v48 }
  0xb0   :  { %v226_v53 = vadd.f32 %v199_v51, %v162_v49  ;;  %v257_v56 = vld [vmem:[#allocation3] sm:$0xff] }
  0xb1   :  { %241 = vst.msk [vmem:[#allocation4 + $0x18] sm:$0xff] %vm43_vm0, %v225_v52  ;;  %v258_v57 = vmax.f32 %v257_v56, 1e-16  ;;  %v262_v60 = vld [vmem:[#allocation4 + $0x8] sm:$0xff] }
  0xb2   :  { %242 = vst.msk [vmem:[#allocation4 + $0x20] sm:$0xff] %vm43_vm0, %v226_v53  ;;  %v201_v58 = vpop.xlane.xlu0 %200  ;;  %v278_v3 = vmax.f32 %v262_v60, 1e-16 }
  0xb3   :  { %v203_v59 = vpop.xlane.xlu1 %202  ;;  %v227_v61 = vadd.f32 %v201_v58, %v163_v54  ;;  %432 = vrsqrt.f32 %v258_v57 }
  0xb4   :  { %v228_v62 = vadd.f32 %v203_v59, %v164_v55  ;;  %v261_v63 = vld [vmem:[#allocation4] sm:$0xff] }
  0xb5   :  { %243 = vst.msk [vmem:[#allocation4 + $0x28] sm:$0xff] %vm43_vm0, %v227_v61  ;;  %v277_v2 = vmax.f32 %v261_v63, 1e-16  ;;  %v263_v6 = vld [vmem:[#allocation4 + $0x10] sm:$0xff] }
  0xb6   :  { %244 = vst.msk [vmem:[#allocation4 + $0x30] sm:$0xff] %vm43_vm0, %v228_v62  ;;  %v205_v4 = vpop.xlane.xlu0 %204  ;;  %v279_v11 = vmax.f32 %v263_v6, 1e-16 }
  0xb7   :  { %v207_v5 = vpop.xlane.xlu1 %206  ;;  %434 = vrsqrt.f32 %v277_v2  ;;  %v229_v7 = vadd.f32 %v205_v4, %v165_v0 }
  0xb8   :  { %v230_v8 = vadd.f32 %v207_v5, %v166_v1  ;;  %436 = vrsqrt.f32 %v278_v3  ;;  %v264_v13 = vld [vmem:[#allocation4 + $0x18] sm:$0xff] }
  0xb9   :  { %245 = vst.msk [vmem:[#allocation4 + $0x38] sm:$0xff] %vm43_vm0, %v229_v7  ;;  %438 = vrsqrt.f32 %v279_v11  ;;  %v280_v19 = vmax.f32 %v264_v13, 1e-16  ;;  %v265_v20 = vld [vmem:[#allocation4 + $0x20] sm:$0xff] }
  0xba   :  { %246 = vst.msk [vmem:[#allocation4 + $0x40] sm:$0xff] %vm43_vm0, %v230_v8  ;;  %v209_v12 = vpop.xlane.xlu0 %208  ;;  %v281_v29 = vmax.f32 %v265_v20, 1e-16 }
  0xbb   :  { %v211_v14 = vpop.xlane.xlu1 %210  ;;  %v231_v15 = vadd.f32 %v209_v12, %v167_v9  ;;  %440 = vrsqrt.f32 %v280_v19 }
  0xbc   :  { %v232_v16 = vadd.f32 %v211_v14, %v168_v10  ;;  %v266_v30 = vld [vmem:[#allocation4 + $0x28] sm:$0xff]  ;;  %442 = vrsqrt.f32 %v281_v29  ;;  %v348_v14 = vlaneseq }
  0xbd   :  { %247 = vst.msk [vmem:[#allocation4 + $0x48] sm:$0xff] %vm43_vm0, %v231_v15  ;;  %v282_v38 = vmax.f32 %v266_v30, 1e-16  ;;  %v267_v40 = vld [vmem:[#allocation4 + $0x30] sm:$0xff] }
  0xbe   :  { %248 = vst.msk [vmem:[#allocation4 + $0x50] sm:$0xff] %vm43_vm0, %v232_v16  ;;  %v213_v21 = vpop.xlane.xlu0 %212  ;;  %v283_v43 = vmax.f32 %v267_v40, 1e-16  ;;  %v349_v15 = vshrl.u32 %v348_v14, 7 }
  0xbf   :  { %v215_v22 = vpop.xlane.xlu1 %214  ;;  %v233_v23 = vadd.f32 %v213_v21, %v169_v17  ;;  %444 = vrsqrt.f32 %v282_v38 }
  0xc0   :  { %v234_v24 = vadd.f32 %v215_v22, %v170_v18  ;;  %v433_v25 = vpop.eup %432  ;;  %v268_v45 = vld [vmem:[#allocation4 + $0x38] sm:$0xff]  ;;  %446 = vrsqrt.f32 %v283_v43  ;;  %v350_v16 = vsub.s32 0, %v349_v15 }
  0xc1   :  { %v260_v28 = vmul.f32 20.0, %v433_v25  ;;  %249 = vst.msk [vmem:[#allocation4 + $0x58] sm:$0xff] %vm43_vm0, %v233_v23  ;;  %v284_v46 = vmax.f32 %v268_v45, 1e-16  ;;  %v269_v48 = vld [vmem:[#allocation4 + $0x40] sm:$0xff] }
  0xc2   :  { %250 = vst.msk [vmem:[#allocation4 + $0x60] sm:$0xff] %vm43_vm0, %v234_v24  ;;  %v217_v31 = vpop.xlane.xlu0 %216  ;;  %v285_v49 = vmax.f32 %v269_v48, 1e-16 }
  0xc3   :  { %v219_v32 = vpop.xlane.xlu1 %218  ;;  %312 = vperm.xlu1 %430, %v260_v28   ;;  %v235_v33 = vadd.f32 %v217_v31, %v171_v26  ;;  %448 = vrsqrt.f32 %v284_v46 }
  0xc4   :  { %v236_v35 = vadd.f32 %v219_v32, %v172_v27  ;;  %v435_v36 = vpop.eup %434  ;;  %v270_v51 = vld [vmem:[#allocation4 + $0x48] sm:$0xff]  ;;  %450 = vrsqrt.f32 %v285_v49 }
  0xc5   :  { %316 = vxpose.xlu0.b32.start [1/16] (narrow) %v435_v36, 8  ;;  %251 = vst.msk [vmem:[#allocation4 + $0x68] sm:$0xff] %vm43_vm0, %v235_v33  ;;  %v437_v39 = vpop.eup %436  ;;  %v286_v52 = vmax.f32 %v270_v51, 1e-16  ;;  %v271_v54 = vld [vmem:[#allocation4 + $0x50] sm:$0xff] }
  0xc6   :  { %252 = vst.msk [vmem:[#allocation4 + $0x70] sm:$0xff] %vm43_vm0, %v236_v35  ;;  %v221_v41 = vpop.xlane.xlu0 %220  ;;  %v439_v44 = vpop.eup %438  ;;  %v287_v55 = vmax.f32 %v271_v54, 1e-16 }
  0xc7   :  { %v237_v42 = vadd.f32 %v221_v41, %v173_v37  ;;  %452 = vrsqrt.f32 %v286_v52 }
  0xc8   :  { %v441_v47 = vpop.eup %440  ;;  %v272_v57 = vld [vmem:[#allocation4 + $0x58] sm:$0xff]  ;;  %454 = vrsqrt.f32 %v287_v55 }
  0xc9   :  { %317 = vxpose.xlu0.b32.cont [2/16] (narrow) %v437_v39, 8  ;;  %253 = vst.msk [vmem:[#allocation4 + $0x78] sm:$0xff] %vm43_vm0, %v237_v42  ;;  %v443_v50 = vpop.eup %442  ;;  %v288_v58 = vmax.f32 %v272_v57, 1e-16  ;;  %v273_v60 = vld [vmem:[#allocation4 + $0x60] sm:$0xff] }
  0xca   :  { %v289_v61 = vmax.f32 %v273_v60, 1e-16 }
  0xcb   :  { %456 = vrsqrt.f32 %v288_v58 }
  0xcc   :  { %v445_v53 = vpop.eup %444  ;;  %v274_v63 = vld [vmem:[#allocation4 + $0x68] sm:$0xff]  ;;  %458 = vrsqrt.f32 %v289_v61 }
  0xcd   :  { %318 = vxpose.xlu0.b32.cont [3/16] (narrow) %v439_v44, 8  ;;  %v447_v56 = vpop.eup %446  ;;  %v290_v0 = vmax.f32 %v274_v63, 1e-16  ;;  %v275_v2 = vld [vmem:[#allocation4 + $0x70] sm:$0xff] }
  0xce   :  { %v291_v3 = vmax.f32 %v275_v2, 1e-16 }
  0xcf   :  { %460 = vrsqrt.f32 %v290_v0 }
  0xd0   :  { %v449_v59 = vpop.eup %448  ;;  %v276_v5 = vld [vmem:[#allocation4 + $0x78] sm:$0xff]  ;;  %462 = vrsqrt.f32 %v291_v3 }
  0xd1   :  { %319 = vxpose.xlu0.b32.cont [4/16] (narrow) %v441_v47, 8  ;;  %v451_v62 = vpop.eup %450  ;;  %v292_v6 = vmax.f32 %v276_v5, 1e-16 }
  0xd3   :  { %464 = vrsqrt.f32 %v292_v6 }
  0xd4   :  { %v453_v1 = vpop.eup %452 }
  0xd5   :  { %320 = vxpose.xlu0.b32.cont [5/16] (narrow) %v443_v50, 8  ;;  %v455_v4 = vpop.eup %454 }
  0xd8   :  { %v457_v7 = vpop.eup %456 }
  0xd9   :  { %321 = vxpose.xlu0.b32.cont [6/16] (narrow) %v445_v53, 8  ;;  %v459_v8 = vpop.eup %458 }
  0xdc   :  { %v461_v9 = vpop.eup %460 }
  0xdd   :  { %322 = vxpose.xlu0.b32.cont [7/16] (narrow) %v447_v56, 8  ;;  %v463_v10 = vpop.eup %462 }
  0xe0   :  { %v465_v11 = vpop.eup %464 }
  0xe1   :  { %323 = vxpose.xlu0.b32.cont [8/16] (narrow) %v449_v59, 8 }
  0xe5   :  { %324 = vxpose.xlu0.b32.cont [9/16] (narrow) %v451_v62, 8 }
  0xe9   :  { %325 = vxpose.xlu0.b32.cont [10/16] (narrow) %v453_v1, 8 }
  0xed   :  { %326 = vxpose.xlu0.b32.cont [11/16] (narrow) %v455_v4, 8 }
  0xf1   :  { %327 = vxpose.xlu0.b32.cont [12/16] (narrow) %v457_v7, 8 }
  0xf5   :  { %328 = vxpose.xlu0.b32.cont [13/16] (narrow) %v459_v8, 8 }
  0xf9   :  { %329 = vxpose.xlu0.b32.cont [14/16] (narrow) %v461_v9, 8 }
  0xfd   :  { %330 = vxpose.xlu0.b32.cont [15/16] (narrow) %v463_v10, 8 }
 0x101   :  { %331 = vxpose.xlu0.b32.end [16/16] (narrow) %v465_v11, 8 }
 0x11c   :  { %v145_v12 = vpop.f32.mrf.mxu0 }
 0x11e   :  { %v421_v13 = vpop.f32.mrf.mxu0 }
 0x12a   :  { %431 = vset.pattern.permute.xlu0 %v538_v34 }
 0x13e   :  { %v313_v17 = vpop.permute.xlu1 %312 }
 0x13f   :  { %v315_v19 = vmul.f32 %v313_v17, %v145_v12 }
 0x141   :  { %v332_v18 = vpop.trf.xlu0 }
 0x142   :  { %v351_v20 = vrot.slane %v332_v18, %v350_v16 }
 0x144   :  { %v352_v21 = vmul.f32 %v351_v20, %v315_v19 }
 0x146   :  { %353 = vst [vmem:[#allocation10] sm:$0xff] %v352_v21 }
 0x147   :  { %517 = shalt.err (!%p514_p0)
}
 0x148   :  { %363 = dma.vmem_to_hbm [thread:$0]  %s361_s1, 128, %s661_s2, [#allocation7]  }
 0x149   :  { %530 = dma.done.wait [#allocation7], 128  }
 0x14a   :  { %531 = vsyncadd [#allocation7], 4294967168 }
 0x14b   :  { %367 = vsyncpa [#allocation6], 1 }
 0x14c   :  { %368 = vsyncpa [#allocation9], 1 }
 0x14d   :  { %369 = vsyncpa [#allocation7], 1 }

</bundles_post_ra>
